<compile_context>
chip_gen: v7x
topology: tpu7x:2x2x1
jax: 0.10.0
libtpu: 0.0.40
codegen_flags: <defaults>
</compile_context>

<pallas_src>
import jax
import jax.numpy as jnp
from jax.experimental import pallas as pl
from jax.experimental.pallas import tpu as pltpu


def _weighted_cost_kernel(w2_ref, cs_ref, ds_ref, out_ref):
    # w2_ref:  (1, 1)    f32 squared weight in SMEM
    # cs_ref:  (tm, D)   candidate features (native dtype)
    # ds_ref:  (tn, D)   detection features (native dtype, untransposed)
    # out_ref: (tm, tn)  weighted cost tile
    w2 = w2_ref[0, 0]
    cs = cs_ref[...]
    ds = ds_ref[...]

    # Pairwise dot products on the MXU in native dtype, f32 accumulation (NT matmul).
    dots = jax.lax.dot_general(
        cs, ds, (((1,), (1,)), ((), ())), preferred_element_type=jnp.float32)

    # Fused squared norms in f32.
    cs32 = cs.astype(jnp.float32)
    cs_sq = jnp.sum(cs32 * cs32, axis=-1, keepdims=True)            # (tm, 1)
    # Row norm produced directly lane-dense as (1, tn) via a tiny ones-matmul
    # (avoids an in-kernel column->row relayout).
    ds32 = ds.astype(jnp.float32)
    ones_row = jnp.ones((1, ds32.shape[-1]), jnp.float32)
    ds_sq = jax.lax.dot_general(
        ones_row, ds32 * ds32, (((1,), (1,)), ((), ())),
        preferred_element_type=jnp.float32)                         # (1, tn)

    # Weight folded inside the sqrt: sqrt(w^2 * d2) == w * sqrt(d2)  (w >= 0).
    # The clamp at 0 must stay: mixed-precision dots can push d2 slightly
    # negative, and ragged-edge tiles read unspecified out-of-bounds rows
    # (those outputs are masked out, but the clamp keeps the lanes finite).
    d2 = jnp.maximum(w2 * cs_sq + w2 * ds_sq - (2.0 * w2) * dots, 0.0)
    out_ref[...] = jnp.sqrt(d2).astype(out_ref.dtype)


def _round_up(x: int, k: int) -> int:
    return ((x + k - 1) // k) * k


def _tensorcores_per_chip() -> int:
    """Best-effort detection of multi-TensorCore chips (v7x, v4/v5p megacore)."""
    try:
        kind = jax.devices()[0].device_kind.lower()
    except Exception:
        return 1
    if "v7" in kind or "v4" in kind or "v5p" in kind:
        return 2
    return 1


_VMEM_TILE_BUDGET = 12 * 1024 * 1024   # double-buffered working set target (bytes)
_VMEM_LIMIT_BYTES = 32 * 1024 * 1024   # safe on v5e (128 MiB phys) .. v7x (64 MiB phys)


def _choose_tiles(n: int, m: int, d: int, in_itemsize: int, out_itemsize: int):
    """VMEM-budgeted tile selection; keeps output stores lane-dense (tn >= 128)."""
    tm = min(512, _round_up(n, 8))
    tn = min(512, _round_up(m, 128))

    def vmem_bytes(tm_, tn_):
        # double-buffered cs + ds tiles + double-buffered output tile
        return 2 * (tm_ * d + tn_ * d) * in_itemsize + 2 * tm_ * tn_ * out_itemsize

    # Shrink tm first (lane-dense output width is the bigger lever), never below 8/128.
    while vmem_bytes(tm, tn) > _VMEM_TILE_BUDGET and tm > 8:
        tm = max(8, tm // 2)
    while vmem_bytes(tm, tn) > _VMEM_TILE_BUDGET and tn > 128:
        tn = max(128, tn // 2)

    # Multi-TensorCore chips: avoid a (1,1) grid on medium/large problems so the
    # "parallel" axes actually shard work across cores.
    if _tensorcores_per_chip() >= 2:
        if pl.cdiv(n, tm) * pl.cdiv(m, tn) < 2 and tm * tn >= 256 * 512:
            if tn >= 256:
                tn //= 2
            elif tm >= 16:
                tm //= 2
    return tm, tn


def weighted_cost(cs: jax.Array, ds: jax.Array, weight, *, tm: int | None = None,
                  tn: int | None = None, out_dtype=jnp.float32) -> jax.Array:
    """weight * pairwise_euclidean_cost(cs, ds) -> (N, M), single fused Pallas kernel."""
    n, d = cs.shape
    m, d2 = ds.shape
    assert d == d2, "feature dims must match"

    # Weight is folded as w^2 inside the kernel; assumes a non-negative weight
    # (standard for assignment costs).
    try:
        assert float(weight) >= 0.0, "weight must be non-negative"
    except (TypeError, jax.errors.TracerArrayConversionError):
        pass  # traced weight: assumed non-negative

    in_itemsize = jnp.dtype(cs.dtype).itemsize
    out_itemsize = jnp.dtype(out_dtype).itemsize

    auto_tm, auto_tn = _choose_tiles(n, m, d, in_itemsize, out_itemsize)
    tm = auto_tm if tm is None else tm
    tn = auto_tn if tn is None else tn
    assert tm % 8 == 0 and tn % 128 == 0, "tm must be %8==0, tn must be %128==0"

    grid = (pl.cdiv(n, tm), pl.cdiv(m, tn))

    w2 = (jnp.asarray(weight, dtype=jnp.float32) ** 2).reshape(1, 1)

    cost = pl.CostEstimate(
        flops=2 * n * m * d + 3 * (n + m) * d + 5 * n * m,
        transcendentals=n * m,
        bytes_accessed=n * d * in_itemsize + m * d * in_itemsize
        + n * m * out_itemsize + 4,
    )

    return pl.pallas_call(
        _weighted_cost_kernel,
        out_shape=jax.ShapeDtypeStruct((n, m), out_dtype),
        grid=grid,
        in_specs=[
            pl.BlockSpec(memory_space=pltpu.MemorySpace.SMEM),   # w^2 (1,1)
            pl.BlockSpec((tm, d), lambda i, j: (i, 0)),          # cs tile
            pl.BlockSpec((tn, d), lambda i, j: (j, 0)),          # ds tile (untransposed)
        ],
        out_specs=pl.BlockSpec((tm, tn), lambda i, j: (i, j)),
        compiler_params=pltpu.CompilerParams(
            dimension_semantics=("parallel", "parallel"),
            vmem_limit_bytes=_VMEM_LIMIT_BYTES),
        cost_estimate=cost,
    )(w2, cs, ds)


def weighted_cost_ref(cs, ds, weight):
    cs32 = cs.astype(jnp.float32)
    ds32 = ds.astype(jnp.float32)
    d2 = (
        jnp.sum(cs32 * cs32, axis=-1, keepdims=True)
        + jnp.sum(ds32 * ds32, axis=-1, keepdims=True).T
        - 2.0 * cs32 @ ds32.T
    )
    return jnp.float32(weight) * jnp.sqrt(jnp.maximum(d2, 0.0))


if __name__ == "__main__":
    key = jax.random.PRNGKey(0)
    k1, k2, k3, k4 = jax.random.split(key, 4)
    weight = 0.75

    # Case 1: tracking-sized problem (single ragged tile, no wrapper pad/slice).
    N, M, D = 8, 16, 32
    cs = jax.random.normal(k1, (N, D), dtype=jnp.float32)
    ds = jax.random.normal(k2, (M, D), dtype=jnp.float32)

    out = weighted_cost(cs, ds, weight)
    jax.block_until_ready(out)
    ref = weighted_cost_ref(cs, ds, weight)
    assert out.shape == (N, M) and out.dtype == jnp.float32
    assert jnp.allclose(out, ref, atol=1e-4, rtol=1e-4), "mismatch vs reference (case 1)"

    # Case 2: multi-tile grid with ragged edges + bf16 inputs (exercises index
    # maps, edge masking, and the native-dtype MXU path). grid = (3, 3).
    N2, M2, D2 = 24, 300, 32
    cs2 = jax.random.normal(k3, (N2, D2), dtype=jnp.bfloat16)
    ds2 = jax.random.normal(k4, (M2, D2), dtype=jnp.bfloat16)
    out2 = weighted_cost(cs2, ds2, weight, tm=8, tn=128)
    jax.block_until_ready(out2)
    ref2 = weighted_cost_ref(cs2, ds2, weight)
    assert out2.shape == (N2, M2) and out2.dtype == jnp.float32
    assert jnp.allclose(out2, ref2, atol=5e-2, rtol=5e-2), "mismatch vs reference (case 2)"

    # Case 3: bf16 cost matrix (halves the dominant HBM writeback stream).
    out3 = weighted_cost(cs, ds, weight, out_dtype=jnp.bfloat16)
    jax.block_until_ready(out3)
    assert out3.shape == (N, M) and out3.dtype == jnp.bfloat16
    assert jnp.allclose(out3.astype(jnp.float32), ref, atol=5e-2, rtol=5e-2), \
        "mismatch vs reference (case 3, bf16 output)"

    print("KERNEL_OK")
</pallas_src>

<mosaic_0001>
module attributes {stable_mosaic.version = 11 : i64} {
  func.func @_weighted_cost_kernel(%arg0: i32, %arg1: i32, %arg2: memref<1x1xf32, #tpu.memory_space<smem>>, %arg3: memref<8x32xf32, #tpu.memory_space<vmem>>, %arg4: memref<128x32xf32, #tpu.memory_space<vmem>>, %arg5: memref<8x128xf32, #tpu.memory_space<vmem>>) attributes {dimension_semantics = [#tpu.dimension_semantics<parallel>, #tpu.dimension_semantics<parallel>], iteration_bounds = array<i64: 1, 1>, scalar_prefetch = 0 : i64, scratch_operands = 0 : i64, tpu.core_type = #tpu.core_type<tc>, window_params = [{transform_indices = @transform_0, window_bounds = array<i64: 1, 1>}, {transform_indices = @transform_1, window_bounds = array<i64: 8, 32>}, {transform_indices = @transform_2, window_bounds = array<i64: 128, 32>}, {transform_indices = @transform_3, window_bounds = array<i64: 8, 128>}]} {
    %c0 = arith.constant 0 : index
    %c0_0 = arith.constant 0 : index
    %0 = memref.load %arg2[%c0, %c0_0] : memref<1x1xf32, #tpu.memory_space<smem>>
    %c0_1 = arith.constant 0 : index
    %c0_2 = arith.constant 0 : index
    %1 = vector.load %arg3[%c0_1, %c0_2] : memref<8x32xf32, #tpu.memory_space<vmem>>, vector<8x32xf32>
    %c0_3 = arith.constant 0 : index
    %c0_4 = arith.constant 0 : index
    %2 = vector.load %arg4[%c0_3, %c0_4] : memref<128x32xf32, #tpu.memory_space<vmem>>, vector<128x32xf32>
    %cst = arith.constant dense<0.000000e+00> : vector<8x128xf32>
    %3 = tpu.matmul %1, %2, %cst {dimension_numbers = #tpu.dot_dimension_numbers<[1], [1], [0], [0], [0, 0, 1, 0], [], []>} : vector<8x32xf32>, vector<128x32xf32>, vector<8x128xf32> -> vector<8x128xf32>
    %4 = arith.mulf %1, %1 : vector<8x32xf32>
    %cst_5 = arith.constant dense<0.000000e+00> : vector<8xf32>
    %5 = vector.multi_reduction <add>, %4, %cst_5 [1] : vector<8x32xf32> to vector<8xf32>
    %6 = vector.shape_cast %5 : vector<8xf32> to vector<8x1xf32>
    %cst_6 = arith.constant 1.000000e+00 : f32
    %7 = vector.broadcast %cst_6 : f32 to vector<1x32xf32>
    %8 = arith.mulf %2, %2 : vector<128x32xf32>
    %cst_7 = arith.constant dense<0.000000e+00> : vector<1x128xf32>
    %9 = tpu.matmul %7, %8, %cst_7 {dimension_numbers = #tpu.dot_dimension_numbers<[1], [1], [0], [0], [0, 0, 1, 0], [], []>} : vector<1x32xf32>, vector<128x32xf32>, vector<1x128xf32> -> vector<1x128xf32>
    %10 = vector.broadcast %0 : f32 to vector<8x1xf32>
    %11 = arith.mulf %10, %6 : vector<8x1xf32>
    %12 = vector.broadcast %0 : f32 to vector<1x128xf32>
    %13 = arith.mulf %12, %9 : vector<1x128xf32>
    %14 = vector.broadcast %11 : vector<8x1xf32> to vector<8x128xf32>
    %15 = vector.broadcast %13 : vector<1x128xf32> to vector<8x128xf32>
    %16 = arith.addf %14, %15 : vector<8x128xf32>
    %cst_8 = arith.constant 2.000000e+00 : f32
    %17 = arith.mulf %cst_8, %0 : f32
    %18 = vector.broadcast %17 : f32 to vector<8x128xf32>
    %19 = arith.mulf %18, %3 : vector<8x128xf32>
    %20 = arith.subf %16, %19 : vector<8x128xf32>
    %cst_9 = arith.constant 0.000000e+00 : f32
    %21 = vector.broadcast %cst_9 : f32 to vector<8x128xf32>
    %22 = arith.maximumf %20, %21 : vector<8x128xf32>
    %23 = math.sqrt %22 : vector<8x128xf32>
    %c0_10 = arith.constant 0 : index
    %c0_11 = arith.constant 0 : index
    %24 = vector.load %arg5[%c0_10, %c0_11] : memref<8x128xf32, #tpu.memory_space<vmem>>, vector<8x128xf32>
    tpu.vector_store %arg5[%c0_10, %c0_11], %23 {strides = array<i32>} : memref<8x128xf32, #tpu.memory_space<vmem>>, vector<8x128xf32>,
    return
  }
  func.func @transform_0(%arg0: i32, %arg1: i32) -> (i32, i32) {
    %c0_i32 = arith.constant 0 : i32
    %c0_i32_0 = arith.constant 0 : i32
    %c0_i32_1 = arith.constant 0 : i32
    return %c0_i32, %c0_i32_0 : i32, i32
  }
  func.func @transform_1(%arg0: i32, %arg1: i32) -> (i32, i32) {
    %c0_i32 = arith.constant 0 : i32
    %c0_i32_0 = arith.constant 0 : i32
    return %arg0, %c0_i32 : i32, i32
  }
  func.func @transform_2(%arg0: i32, %arg1: i32) -> (i32, i32) {
    %c0_i32 = arith.constant 0 : i32
    %c0_i32_0 = arith.constant 0 : i32
    return %arg1, %c0_i32 : i32, i32
  }
  func.func @transform_3(%arg0: i32, %arg1: i32) -> (i32, i32) {
    %c0_i32 = arith.constant 0 : i32
    return %arg0, %arg1 : i32, i32
  }
}

</mosaic_0001>

<bundles_post_ra>
// kernel: tpu_custom_call.1
= control target key start
LH: loop header
LB: loop body
LE: loop exit
PB: predicated region body
PF: predicated region fallthrough
CT: control target
= control target key end

     0   :  { %9 = vsyncpa [#allocation4], 0  ;;  %s778_s0 = inlined_call_operand.<no memory space> [shape: f32[1,1], index: 0, kind: input, shape index: {}]   ;;  %s779_s1 = inlined_call_operand.hbm [shape: f32[8,32], index: 1, kind: input, shape index: {}]   ;;  %s780_s2 = inlined_call_operand.hbm [shape: f32[16,32], index: 2, kind: input, shape index: {}]   ;;  %s781_s3 = inlined_call_operand.hbm [shape: f32[8,16], index: 3, kind: output, shape index: {}]  }
   0x1   :  { %10 = vsyncpa [#allocation7], 0 }
   0x2   :  { %11 = vsyncpa [#allocation5], 0  ;;  %s645_s12 = smov [#allocation3]   ;;  %s573_s16 = scalar_lea.hbm %s779_s1, 128 }
   0x3   :  { %s20_s13 = sshll.u32 %s645_s12, 4  ;;  %p574_p0 = scmp.ne.s32.totalorder %s779_s1, %s573_s16  ;;  %s21_s13 = int_to_ptr.vmem [resolvable:$true] %s20_s13 }
   0x4   :  { %p577_p1 = scmp.lt.u32.totalorder %s573_s16, %s779_s1 }
   0x6   :  { %p579_p2 = pnand %p577_p1, %p574_p0 }
   0x8   :  { %582 = shalt.err (!%p579_p2)
}
   0x9   :  { %s583_s21 = scalar_lea.vmem %s21_s13, 128  ;;  %p588_p4 = scmp.lt.s32.totalorder %s21_s13, %s21_s13 }
   0xa   :  { %p584_p3 = scmp.ne.s32.totalorder %s21_s13, %s583_s21  ;;  %p589_p5 = scmp.lt.s32.totalorder %s583_s21, %s583_s21 }
   0xc   :  { %p590_p6 = por %p589_p5, %p588_p4 }
   0xe   :  { %p591_p7 = pnand %p590_p6, %p584_p3 }
  0x10   :  { %594 = shalt.err (!%p591_p7)
}
  0x11   :  { %23 = dma.hbm_to_vmem [thread:$0]  %s779_s1, 128, %s21_s13, [#allocation4]  }
  0x12   :  { %28 = vsyncadd [#allocation7], 1792  ;;  %s646_s24 = smov [#allocation6]   ;;  %s595_s28 = scalar_lea.hbm %s780_s2, 256 }
  0x13   :  { %s29_s25 = sshll.u32 %s646_s24, 4  ;;  %p596_p8 = scmp.ne.s32.totalorder %s780_s2, %s595_s28  ;;  %s30_s25 = int_to_ptr.vmem [resolvable:$true] %s29_s25 }
  0x14   :  { %p599_p9 = scmp.lt.u32.totalorder %s595_s28, %s780_s2 }
  0x16   :  { %p601_p10 = pnand %p599_p9, %p596_p8 }
  0x18   :  { %604 = shalt.err (!%p601_p10)
}
  0x19   :  { %s605_s6 = scalar_lea.vmem %s30_s25, 256  ;;  %s609_s1 = scalar_lea.vmem %s30_s25, 2048 }
  0x1a   :  { %p606_p11 = scmp.ne.s32.totalorder %s30_s25, %s605_s6  ;;  %p610_p12 = scmp.lt.s32.totalorder %s30_s25, %s30_s25 }
  0x1b   :  { %p611_p13 = scmp.lt.s32.totalorder %s609_s1, %s605_s6 }
  0x1d   :  { %p612_p0 = por %p611_p13, %p610_p12 }
  0x1f   :  { %p613_p1 = pnand %p612_p0, %p606_p11 }
  0x21   :  { %616 = shalt.err (!%p613_p1)
}
  0x22   :  { %s647_s7 = smov 128   ;;  %s648_s8 = smov 8  }
  0x23   :  { %35 = dma.hbm_to_vmem [thread:$0]  %s780_s2, 256, %s30_s25, [#allocation7], %s647_s7, %s647_s7, %s648_s8  }
  0x24   :  { %639 = dma.done.wait [#allocation4], 128  }
  0x25   :  { %640 = vsyncadd [#allocation4], 4294967168 }
  0x26   :  { %641 = dma.done.wait [#allocation7], 2048  }
  0x27   :  { %642 = vsyncadd [#allocation7], 4294965248  ;;  %v649_v0 = vmov 0.0|0.0   ;;  %vm650_vm0 = vmmov 0   ;;  %v651_v1 = vmov 0.0   ;;  %vm60_vm1 = vcmask 261120  }
  0x28   :  { %530 = vmatprep.subr.bf16.mxu1 %v649_v0  ;;  %498 = vmatprep.subr.bf16.mxu0 %v649_v0  ;;  %v44_v2 = vld [vmem:[#allocation6] sm:$0xff]  ;;  %v45_v3 = vld [vmem:[#allocation6 + $0x8] sm:$0xff]  ;;  %vm702_vm2 = vmpackc.low %vm60_vm1, %vm60_vm1  ;;  %v652_v54 = vmov 1.0   ;;  %v326_v55 = vlaneseq  ;;  %s331_s12 = smul.f32 2.0, %s778_s0  ;;  %v323_v57 = vstv %s778_s0  ;;  %s653_s15 = smov [#allocation8]  }
  0x29   :  { %495 = vmatprep.mubr.msk.f32.mxu1 %vm650_vm0, %v651_v1  ;;  %460 = vmatprep.mubr.msk.f32.mxu0 %vm650_vm0, %v651_v1  ;;  %v186_v4 = vmul.f32 %v44_v2, %v44_v2  ;;  %v187_v5 = vmul.f32 %v45_v3, %v45_v3  ;;  %v499_v6 = vpack.c.bf16 %v45_v3, %v44_v2  ;;  %v46_v8 = vld [vmem:[#allocation6 + $0x10] sm:$0xff]  ;;  %v47_v9 = vld [vmem:[#allocation6 + $0x18] sm:$0xff]  ;;  %v48_v17 = vld [vmem:[#allocation6 + $0x20] sm:$0xff]  ;;  %s350_s16 = sshll.u32 %s653_s15, 4  ;;  %s351_s16 = int_to_ptr.vmem [resolvable:$true] %s350_s16 }
  0x2a   :  { %v188_v11 = vmul.f32 %v46_v8, %v46_v8  ;;  %v189_v12 = vmul.f32 %v47_v9, %v47_v9  ;;  %v503_v13 = vpack.c.bf16 %v47_v9, %v46_v8  ;;  %v712_v14 = vld [vmem:[#allocation3] sm:$0xff]  ;;  %v49_v18 = vld [vmem:[#allocation6 + $0x28] sm:$0xff]  ;;  %v190_v20 = vmul.f32 %v48_v17, %v48_v17  ;;  %v50_v24 = vld [vmem:[#allocation6 + $0x30] sm:$0xff]  ;;  %s617_s0 = scalar_lea.vmem %s351_s16, 128  ;;  %p622_p3 = scmp.lt.s32.totalorder %s351_s16, %s351_s16 }
  0x2b   :  { %v531_v10 = vpack.c.bf16 %v187_v5, %v186_v4  ;;  %501 = vmatpush3.bf16.xpose.msk.msra.mxu0 %vm702_vm2, %v499_v6  ;;  %v182_v15 = vmul.f32 %v712_v14, %v712_v14  ;;  %v191_v21 = vmul.f32 %v49_v18, %v49_v18  ;;  %v507_v22 = vpack.c.bf16 %v49_v18, %v48_v17  ;;  %v51_v25 = vld [vmem:[#allocation6 + $0x38] sm:$0xff]  ;;  %v52_v30 = vld [vmem:[#allocation6 + $0x40] sm:$0xff]  ;;  %v53_v31 = vld [vmem:[#allocation6 + $0x48] sm:$0xff]  ;;  %p618_p2 = scmp.ne.s32.totalorder %s351_s16, %s617_s0  ;;  %p623_p4 = scmp.lt.s32.totalorder %s617_s0, %s617_s0 }
  0x2c   :  { %502 = vmatprep.subr.bf16.mxu0 %v649_v0  ;;  %v535_v16 = vpack.c.bf16 %v189_v12, %v188_v11  ;;  %v192_v26 = vmul.f32 %v50_v24, %v50_v24  ;;  %v193_v27 = vmul.f32 %v51_v25, %v51_v25  ;;  %v511_v28 = vpack.c.bf16 %v51_v25, %v50_v24  ;;  %v54_v36 = vld [vmem:[#allocation6 + $0x50] sm:$0xff]  ;;  %v55_v37 = vld [vmem:[#allocation6 + $0x58] sm:$0xff]  ;;  %v56_v42 = vld [vmem:[#allocation6 + $0x60] sm:$0xff] }
  0x2d   :  { %533 = vmatpush3.bf16.xpose.msk.msra.mxu1 %vm702_vm2, %v531_v10  ;;  %v183_v19 = vsel %vm60_vm1, %v182_v15, 0.0  ;;  %v539_v23 = vpack.c.bf16 %v191_v21, %v190_v20  ;;  %v194_v32 = vmul.f32 %v52_v30, %v52_v30  ;;  %v195_v33 = vmul.f32 %v53_v31, %v53_v31  ;;  %v57_v43 = vld [vmem:[#allocation6 + $0x68] sm:$0xff]  ;;  %v58_v48 = vld [vmem:[#allocation6 + $0x70] sm:$0xff]  ;;  %v59_v49 = vld [vmem:[#allocation6 + $0x78] sm:$0xff]  ;;  %p624_p5 = por %p623_p4, %p622_p3 }
  0x2e   :  { %534 = vmatprep.subr.bf16.mxu1 %v649_v0  ;;  %184 = vadd.xlane.f32.xlu0 %v183_v19  ;;  %v543_v29 = vpack.c.bf16 %v193_v27, %v192_v26  ;;  %v515_v34 = vpack.c.bf16 %v53_v31, %v52_v30  ;;  %v196_v38 = vmul.f32 %v54_v36, %v54_v36  ;;  %v327_v56 = vshrl.u32 %v326_v55, 7 }
  0x2f   :  { %v547_v35 = vpack.c.bf16 %v195_v33, %v194_v32  ;;  %v197_v39 = vmul.f32 %v55_v37, %v55_v37  ;;  %v519_v40 = vpack.c.bf16 %v55_v37, %v54_v36  ;;  %v198_v44 = vmul.f32 %v56_v42, %v56_v42  ;;  %p625_p6 = pnand %p624_p5, %p618_p2 }
  0x30   :  { %v199_v45 = vmul.f32 %v57_v43, %v57_v43  ;;  %v523_v46 = vpack.c.bf16 %v57_v43, %v56_v42  ;;  %v200_v50 = vmul.f32 %v58_v48, %v58_v48  ;;  %v201_v51 = vmul.f32 %v59_v49, %v59_v49 }
  0x31   :  { %v551_v41 = vpack.c.bf16 %v197_v39, %v196_v38  ;;  %v527_v52 = vpack.c.bf16 %v59_v49, %v58_v48  ;;  %v328_v60 = vsub.s32 0, %v327_v56  ;;  %v332_v63 = vstv %s331_s12 }
  0x32   :  { %v555_v47 = vpack.c.bf16 %v199_v45, %v198_v44  ;;  %v559_v53 = vpack.c.bf16 %v201_v51, %v200_v50 }
  0x33   :  { %505 = vmatpush3.bf16.xpose.msk.msra.mxu0 %vm702_vm2, %v503_v13 }
  0x34   :  { %506 = vmatprep.subr.bf16.mxu0 %v649_v0 }
  0x35   :  { %537 = vmatpush3.bf16.xpose.msk.msra.mxu1 %vm702_vm2, %v535_v16 }
  0x36   :  { %538 = vmatprep.subr.bf16.mxu1 %v649_v0 }
  0x3b   :  { %509 = vmatpush3.bf16.xpose.msk.msra.mxu0 %vm702_vm2, %v507_v22 }
  0x3c   :  { %510 = vmatprep.subr.bf16.mxu0 %v649_v0 }
  0x3d   :  { %541 = vmatpush3.bf16.xpose.msk.msra.mxu1 %vm702_vm2, %v539_v23 }
  0x3e   :  { %542 = vmatprep.subr.bf16.mxu1 %v649_v0 }
  0x43   :  { %513 = vmatpush3.bf16.xpose.msk.msra.mxu0 %vm702_vm2, %v511_v28 }
  0x44   :  { %514 = vmatprep.subr.bf16.mxu0 %v649_v0 }
  0x45   :  { %545 = vmatpush3.bf16.xpose.msk.msra.mxu1 %vm702_vm2, %v543_v29 }
  0x46   :  { %546 = vmatprep.subr.bf16.mxu1 %v649_v0 }
  0x4b   :  { %517 = vmatpush3.bf16.xpose.msk.msra.mxu0 %vm702_vm2, %v515_v34 }
  0x4c   :  { %518 = vmatprep.subr.bf16.mxu0 %v649_v0 }
  0x4d   :  { %549 = vmatpush3.bf16.xpose.msk.msra.mxu1 %vm702_vm2, %v547_v35 }
  0x4e   :  { %550 = vmatprep.subr.bf16.mxu1 %v649_v0 }
  0x53   :  { %521 = vmatpush3.bf16.xpose.msk.msra.mxu0 %vm702_vm2, %v519_v40 }
  0x54   :  { %522 = vmatprep.subr.bf16.mxu0 %v649_v0 }
  0x55   :  { %553 = vmatpush3.bf16.xpose.msk.msra.mxu1 %vm702_vm2, %v551_v41 }
  0x56   :  { %554 = vmatprep.subr.bf16.mxu1 %v649_v0 }
  0x5b   :  { %525 = vmatpush3.bf16.xpose.msk.msra.mxu0 %vm702_vm2, %v523_v46 }
  0x5c   :  { %526 = vmatprep.subr.bf16.mxu0 %v649_v0 }
  0x5d   :  { %557 = vmatpush3.bf16.xpose.msk.msra.mxu1 %vm702_vm2, %v555_v47 }
  0x5e   :  { %558 = vmatprep.subr.bf16.mxu1 %v649_v0 }
  0x63   :  { %529 = vmatpush3.bf16.xpose.msk.msra.mxu0 %vm702_vm2, %v527_v52 }
  0x65   :  { %561 = vmatpush3.bf16.xpose.msk.msra.mxu1 %vm702_vm2, %v559_v53 }
  0x6a   :  { %461 = vmatmul.mubr.msk.f32.vlgmr.msra.gmra.mrb[0].mxu0 %vm60_vm1, %v712_v14 }
  0x6c   :  { %496 = vmatmul.mubr.msk.f32.vlgmr.msra.gmra.mrb[0].mxu1 %vm60_vm1, %v652_v54 }
  0xbb   :  { %v185_v58 = vpop.xlane.xlu0 %184 }
  0xbc   :  { %v324_v2 = vmul.f32 %v323_v57, %v185_v58 }
 0x13d   :  { %v178_v59 = vpop.f32.mrb[0].mxu0 }
 0x13e   :  { %v462_v61 = vpop.f32.mrb[1].mxu0  ;;  %v333_v4 = vmul.f32 %v332_v63, %v178_v59 }
 0x13f   :  { %v319_v62 = vpop.f32.mrb[0].mxu1 }
 0x140   :  { %v325_v0 = vmul.f32 %v323_v57, %v319_v62  ;;  %v497_v1 = vpop.f32.mrb[1].mxu1 }
 0x142   :  { %v329_v3 = vrot.slane %v325_v0, %v328_v60 }
 0x144   :  { %v330_v5 = vadd.f32 %v329_v3, %v324_v2 }
 0x146   :  { %v334_v6 = vsub.f32 %v330_v5, %v333_v4 }
 0x148   :  { %v335_v7 = vmax.f32 %v334_v6, 0.0 }
 0x14a   :  { %571 = vrsqrt.f32 %v335_v7  ;;  %vm338_vm3 = vcmp.eq.f32.partialorder %v335_v7, inf  ;;  %v341_v10 = vand.u32 2147483648, %v335_v7  ;;  %vm340_vm4 = vcmp.eq.f32.partialorder %v335_v7, 0.0 }
 0x154   :  { %v572_v8 = vpop.eup %571 }
 0x155   :  { %v337_v9 = vmul.f32 %v572_v8, %v335_v7 }
 0x157   :  { %v339_v11 = vsel %vm338_vm3, %v335_v7, %v337_v9 }
 0x158   :  { %v342_v12 = vsel %vm340_vm4, %v341_v10, %v339_v11 }
 0x159   :  { %343 = vst [vmem:[#allocation8] sm:$0xff] %v342_v12 }
 0x15a   :  { %628 = shalt.err (!%p625_p6)
}
 0x15b   :  { %s629_s19 = scalar_lea.hbm %s781_s3, 128 }
 0x15c   :  { %p630_p7 = scmp.ne.s32.totalorder %s781_s3, %s629_s19  ;;  %p633_p8 = scmp.lt.u32.totalorder %s629_s19, %s781_s3 }
 0x15e   :  { %p635_p9 = pnand %p633_p8, %p630_p7 }
 0x160   :  { %638 = shalt.err (!%p635_p9)
}
 0x161   :  { %353 = dma.vmem_to_hbm [thread:$0]  %s351_s16, 128, %s781_s3, [#allocation5]  }
 0x162   :  { %643 = dma.done.wait [#allocation5], 128  }
 0x163   :  { %644 = vsyncadd [#allocation5], 4294967168 }
 0x164   :  { %357 = vsyncpa [#allocation4], 1 }
 0x165   :  { %358 = vsyncpa [#allocation7], 1 }
 0x166   :  { %359 = vsyncpa [#allocation5], 1 }

</bundles_post_ra>
